<compile_context>
chip_gen: v6e
topology: v6e:2x2x1
jax: 0.10.0
libtpu: 0.0.40
codegen_flags: <defaults>
</compile_context>

<pallas_src>
import jax
import jax.numpy as jnp
from jax.experimental import pallas as pl
from jax.experimental.pallas import tpu as pltpu


# ---------------------------------------------------------------------------
# Path 1: small table resident in VMEM, one-hot MXU gather, fused transpose.
# ---------------------------------------------------------------------------

def _small_table_kernel(ids_ref, wt_ref, o_ref):
    # ids_ref : (1, tile_l)        int32  VMEM  (token ids for this tile)
    # wt_ref  : (out_dim, in_dim)  VMEM   (transposed table, resident across steps)
    # o_ref   : (out_dim, tile_l)  VMEM   (output tile, already in (D, L) layout)
    in_dim = wt_ref.shape[1]
    tile_l = ids_ref.shape[1]
    vocab = jax.lax.broadcasted_iota(jnp.int32, (in_dim, tile_l), 0)
    onehot = (vocab == ids_ref[...]).astype(wt_ref.dtype)            # (in_dim, tile_l)
    # (out_dim, in_dim) @ (in_dim, tile_l) -> (out_dim, tile_l): the embedding rows,
    # already transposed, straight off the MXU (no XLU transpose, no gather DMAs).
    out = jnp.dot(wt_ref[...], onehot, preferred_element_type=jnp.float32)
    o_ref[...] = out.astype(o_ref.dtype)


def _encoder_small_table(x, weight):
    B, L = x.shape
    in_dim, out_dim = weight.shape
    ids = jnp.clip(x.astype(jnp.int32), 0, in_dim - 1)               # (B, L)

    # Token tile = lane dim of the output: full L when short, else a multiple of 128.
    if L <= 256:
        tile_l, l_pad = L, L
    else:
        tile_l = 256
        l_pad = pl.cdiv(L, tile_l) * tile_l
    if l_pad != L:
        ids = jnp.pad(ids, ((0, 0), (0, l_pad - L)))                  # pad -> row 0 (valid)
    ids3d = ids.reshape(B, 1, l_pad)                                  # keep blocks (1, tile_l)

    wt = jnp.transpose(weight)                                        # (out_dim, in_dim), tiny

    out = pl.pallas_call(
        _small_table_kernel,
        out_shape=jax.ShapeDtypeStruct((B, out_dim, l_pad), weight.dtype),
        grid_spec=pltpu.PrefetchScalarGridSpec(
            num_scalar_prefetch=0,
            grid=(B, l_pad // tile_l),
            in_specs=[
                pl.BlockSpec((None, 1, tile_l), lambda b, l: (b, 0, l)),    # ids tile
                pl.BlockSpec((out_dim, in_dim), lambda b, l: (0, 0)),       # resident table
            ],
            out_specs=pl.BlockSpec((None, out_dim, tile_l), lambda b, l: (b, 0, l)),
        ),
        # Tiny VMEM footprint (table + a few small tiles): default scoped VMEM limits are
        # ample on v5e (16 MiB), v6e (32 MiB) and v7x (32 MiB scoped / 64 MiB physical),
        # so no explicit vmem_limit_bytes is requested.
        compiler_params=pltpu.CompilerParams(
            dimension_semantics=("parallel", "parallel")),
    )(ids3d, wt)

    return out if l_pad == L else out[:, :, :L]


# ---------------------------------------------------------------------------
# Path 2: large table resident in HBM, waved row-gather DMAs into the output block.
# ---------------------------------------------------------------------------

_WAVE = 8          # row DMAs per wave; two waves (16 DMAs, 16 semaphores) in flight


def _hbm_gather_kernel(ids_hbm, w_hbm, o_ref, ids_smem, ids_sem, row_sems):
    # ids_hbm  : (num_steps, T)    int32, HBM (memory_space=pl.ANY)
    # w_hbm    : (in_dim, out_dim) HBM   (memory_space=pl.ANY)
    # o_ref    : (T, out_dim)      VMEM output block -- gathered rows land directly here
    # ids_smem : (1, T)            int32 SMEM scratch (this step's token ids)
    # ids_sem  : (1,)              DMA semaphore for the ids staging copy
    # row_sems : (_WAVE, 2)        DMA semaphores: ring of two waves
    T = o_ref.shape[0]
    n_waves = T // _WAVE
    step = pl.program_id(0)

    # Stage this step's token ids into SMEM: T*4 bytes, independent of total B*L
    # (replaces whole-sequence scalar prefetch).
    ids_cp = pltpu.make_async_copy(ids_hbm.at[pl.ds(step, 1), :], ids_smem, ids_sem.at[0])
    ids_cp.start()
    ids_cp.wait()

    def issue_wave(w):
        base = w * _WAVE
        slot = w % 2
        for j in range(_WAVE):                          # static 8-wide unroll only
            row = ids_smem[0, base + j]                 # SMEM scalar read
            pltpu.make_async_copy(
                w_hbm.at[pl.ds(row, 1), :],             # (1, out_dim) row in HBM
                o_ref.at[pl.ds(base + j, 1), :],        # straight into the output block
                row_sems.at[j, slot],
            ).start()

    def wait_wave(w):
        base = w * _WAVE
        slot = w % 2
        for j in range(_WAVE):
            pltpu.make_async_copy(
                w_hbm.at[pl.ds(0, 1), :],               # src placeholder; wait keys off dst+sem
                o_ref.at[pl.ds(base + j, 1), :],
                row_sems.at[j, slot],
            ).wait()

    issue_wave(0)                                       # prime the first wave

    @pl.loop(0, n_waves)
    def _(w):
        @pl.when(w + 1 < n_waves)
        def _():
            issue_wave(w + 1)                           # keep the next wave in flight
        wait_wave(w)

    # Pin ordering: the pipelined HBM writeback of o_ref must not be hoisted above the
    # gather DMAs that filled it.
    pltpu.touch(o_ref)


def _encoder_hbm_gather(x, weight, *, tokens_per_step=128):
    B, L = x.shape
    in_dim, out_dim = weight.shape
    num_tokens = B * L
    ids = jnp.clip(x.reshape(-1).astype(jnp.int32), 0, in_dim - 1)

    # Large token tile per grid step (default 128) so the ~0.35us per-step overhead is
    # amortized; rounded to the DMA wave size, never larger than the (padded) input.
    tps = int(tokens_per_step)
    tps = pl.cdiv(max(_WAVE, tps), _WAVE) * _WAVE
    tps = min(tps, pl.cdiv(num_tokens, _WAVE) * _WAVE)
    num_padded = pl.cdiv(num_tokens, tps) * tps
    if num_padded != num_tokens:
        ids = jnp.pad(ids, (0, num_padded - num_tokens))              # pad -> row 0 (valid)
    num_steps = num_padded // tps
    ids2d = ids.reshape(num_steps, tps)

    out_flat = pl.pallas_call(
        _hbm_gather_kernel,
        out_shape=jax.ShapeDtypeStruct((num_padded, out_dim), weight.dtype),
        grid_spec=pltpu.PrefetchScalarGridSpec(
            num_scalar_prefetch=0,
            grid=(num_steps,),
            in_specs=[pl.BlockSpec(memory_space=pl.ANY),              # ids stay in HBM
                      pl.BlockSpec(memory_space=pl.ANY)],             # table stays in HBM
            out_specs=pl.BlockSpec((tps, out_dim), lambda t: (t, 0)), # row-dense output tile
            scratch_shapes=[
                pltpu.SMEM((1, tps), jnp.int32),
                pltpu.SemaphoreType.DMA((1,)),
                pltpu.SemaphoreType.DMA((_WAVE, 2)),
            ],
        ),
        compiler_params=pltpu.CompilerParams(
            dimension_semantics=("parallel",)),                       # splits tiles across TCs
    )(ids2d, weight)

    out = out_flat[:num_tokens].reshape(B, L, out_dim)
    # TODO(synk): for this large-table path the (B, L, D) -> (B, D, L) layout change is
    # still a wrapper transpose; fold it in-kernel (XLU tile transpose) once L is padded
    # to a multiple of 128.
    return jnp.transpose(out, (0, 2, 1))                              # (B, out_dim, L)


# ---------------------------------------------------------------------------
# Dispatch + module-level init
# ---------------------------------------------------------------------------

_SMALL_TABLE_BYTES = 2 * 1024 * 1024    # resident-table path: keeps table (+ one-hot tiles)
_SMALL_VOCAB_MAX = 2048                 # well inside every generation's scoped VMEM
                                        # (v5e 16 MiB default scoped, v7x 64 MiB physical).


def encoder_forward(x, weight, *, rate=0.0, training=False,
                    tokens_per_step=128, force_hbm_gather=False):
    """Pallas equivalent of Encoder.forward: (B, L) int ids -> (B, out_dim, L)."""
    # TODO(synk): training-mode dropout (torch RNG stream parity) is not implemented;
    # eval-mode dropout is the identity, which is what is emitted here.
    del rate, training
    in_dim, out_dim = weight.shape
    table_bytes = in_dim * out_dim * weight.dtype.itemsize
    if (not force_hbm_gather
            and table_bytes <= _SMALL_TABLE_BYTES
            and in_dim <= _SMALL_VOCAB_MAX):
        return _encoder_small_table(x, weight)
    return _encoder_hbm_gather(x, weight, tokens_per_step=tokens_per_step)


def init_embedding_weight(key, in_dim, out_dim, dtype=jnp.float32):
    # nn.init.xavier_uniform_: U(-a, a) with a = sqrt(6 / (fan_in + fan_out)).
    # In the PyTorch module xavier_uniform_ runs AFTER nn.Embedding's padding_idx
    # zeroing, so row 0 is NOT zero -- reproduced here.
    bound = (6.0 / (in_dim + out_dim)) ** 0.5
    return jax.random.uniform(key, (in_dim, out_dim), dtype=dtype,
                              minval=-bound, maxval=bound)


if __name__ == "__main__":
    # Shapes consistent with the module: vocab (in_dim)=16, hidden (out_dim)=32,
    # batch=2, sequence length=8, dropout rate=0.1 (identity in eval mode).
    in_dim, out_dim, rate = 16, 32, 0.1
    B, L = 2, 8

    key = jax.random.PRNGKey(0)
    k_w, k_x = jax.random.split(key)
    weight = init_embedding_weight(k_w, in_dim, out_dim)
    x = jax.random.randint(k_x, (B, L), minval=0, maxval=in_dim, dtype=jnp.int32)

    # The module's configuration dispatches to the small-table (resident VMEM, one-hot
    # MXU, fused-transpose) path.  The HBM row-gather path is selected automatically for
    # tables that exceed VMEM (or via force_hbm_gather=True).
    out = jax.block_until_ready(encoder_forward(x, weight, rate=rate))

    ref = jnp.transpose(weight[x], (0, 2, 1))                          # (B, out_dim, L)
    assert out.shape == (B, out_dim, L), out.shape
    assert jnp.allclose(out, ref, atol=1e-6), "mismatch vs reference"

    print("KERNEL_OK")
</pallas_src>

<mosaic_0001>
module attributes {stable_mosaic.version = 11 : i64} {
  func.func @_small_table_kernel(%arg0: i32, %arg1: i32, %arg2: memref<1x1x8xi32, #tpu.memory_space<vmem>>, %arg3: memref<32x16xf32, #tpu.memory_space<vmem>>, %arg4: memref<1x32x8xf32, #tpu.memory_space<vmem>>) attributes {dimension_semantics = [#tpu.dimension_semantics<parallel>, #tpu.dimension_semantics<parallel>], iteration_bounds = array<i64: 2, 1>, scalar_prefetch = 0 : i64, scratch_operands = 0 : i64, tpu.core_type = #tpu.core_type<tc>, window_params = [{transform_indices = @transform_0, window_bounds = array<i64: 1, 1, 8>}, {pipeline_mode = #tpu.pipeline_mode<synchronous>, transform_indices = @transform_1, window_bounds = array<i64: 32, 16>}, {transform_indices = @transform_2, window_bounds = array<i64: 1, 32, 8>}]} {
    %0 = tpu.iota {dimensions = array<i32: 0>} : vector<16x8xi32>
    %c0 = arith.constant 0 : index
    %c0_0 = arith.constant 0 : index
    %c0_1 = arith.constant 0 : index
    %1 = vector.load %arg2[%c0, %c0_0, %c0_1] : memref<1x1x8xi32, #tpu.memory_space<vmem>>, vector<1x1x8xi32>
    %2 = vector.shape_cast %1 : vector<1x1x8xi32> to vector<1x8xi32>
    %3 = vector.broadcast %2 : vector<1x8xi32> to vector<16x8xi32>
    %4 = arith.cmpi eq, %0, %3 : vector<16x8xi32>
    %5 = arith.extui %4 : vector<16x8xi1> to vector<16x8xi32>
    %6 = arith.sitofp %5 : vector<16x8xi32> to vector<16x8xf32>
    %c0_2 = arith.constant 0 : index
    %c0_3 = arith.constant 0 : index
    %7 = vector.load %arg3[%c0_2, %c0_3] : memref<32x16xf32, #tpu.memory_space<vmem>>, vector<32x16xf32>
    %cst = arith.constant dense<0.000000e+00> : vector<32x8xf32>
    %8 = tpu.matmul %7, %6, %cst {dimension_numbers = #tpu.dot_dimension_numbers<[1], [0], [0], [1], [0, 0, 1, 1], [], []>} : vector<32x16xf32>, vector<16x8xf32>, vector<32x8xf32> -> vector<32x8xf32>
    %c0_4 = arith.constant 0 : index
    %c0_5 = arith.constant 0 : index
    %c0_6 = arith.constant 0 : index
    %9 = vector.load %arg4[%c0_4, %c0_5, %c0_6] : memref<1x32x8xf32, #tpu.memory_space<vmem>>, vector<1x32x8xf32>
    %10 = vector.shape_cast %9 : vector<1x32x8xf32> to vector<32x8xf32>
    %11 = vector.shape_cast %8 : vector<32x8xf32> to vector<1x32x8xf32>
    tpu.vector_store %arg4[%c0_4, %c0_5, %c0_6], %11 {strides = array<i32>} : memref<1x32x8xf32, #tpu.memory_space<vmem>>, vector<1x32x8xf32>,
    return
  }
  func.func @transform_0(%arg0: i32, %arg1: i32) -> (i32, i32, i32) {
    %c0_i32 = arith.constant 0 : i32
    %c0_i32_0 = arith.constant 0 : i32
    return %arg0, %c0_i32, %arg1 : i32, i32, i32
  }
  func.func @transform_1(%arg0: i32, %arg1: i32) -> (i32, i32) {
    %c0_i32 = arith.constant 0 : i32
    %c0_i32_0 = arith.constant 0 : i32
    %c0_i32_1 = arith.constant 0 : i32
    return %c0_i32, %c0_i32_0 : i32, i32
  }
  func.func @transform_2(%arg0: i32, %arg1: i32) -> (i32, i32, i32) {
    %c0_i32 = arith.constant 0 : i32
    %c0_i32_0 = arith.constant 0 : i32
    return %arg0, %c0_i32, %arg1 : i32, i32, i32
  }
}

</mosaic_0001>

<bundles_post_ra>
// kernel: tpu_custom_call.1
= control target key start
LH: loop header
LB: loop body
LE: loop exit
PB: predicated region body
PF: predicated region fallthrough
CT: control target
= control target key end

     0   :  { %s471_s9 = smov 0   ;;  %s473_s10 = smov 0   ;;  %s520_s0 = inlined_call_operand.vmem [shape: s32[2,1,8], index: 0, kind: input, shape index: {}]   ;;  %s521_s1 = inlined_call_operand.vmem [shape: f32[32,16], index: 1, kind: input, shape index: {}]   ;;  %s522_s2 = inlined_call_operand.vmem [shape: f32[2,32,8], index: 2, kind: output, shape index: {}]  }
   0x1   :  { %s475_s11 = smov 0  }
   0x2 LB: > { %s24_s12 = sadd.s32 1, %s449_s10  ;;  %p371_p0 = scmp.ge.s32.totalorder %s453_s11, 1  ;;  %s453_s11 = sphi %s475_s11, %s12_s11   ;;  %s449_s10 = sphi %s473_s10, %s524_s10   ;;  %s445_s9 = sphi %s471_s9, %s523_s9  }
   0x3   : > { %p26_p1 = scmp.ge.s32.totalorder %s24_s12, 2  ;;  %p129_p2 = scmp.lt.s32.totalorder %s453_s11, 3 }
   0x5   : > { %s526_s12 = smov (%p26_p1, %s24_s12), 0  ;;  %p130_p3 = pnand %p371_p0, %p129_p2 }
   0x6   : > { %p155_p4 = scmp.lt.s32.totalorder (!%p130_p3), %s445_s9, 1 }
   0x7   : > { %133 = sbr.rel (%p130_p3) target bundleno = 219 (0xdb), region = 28 }
   0xc   : > { %v169_v0 = vlaneseq  ;;  %v183_v1 = vld [vmem:[%s521_s1] sm:$0xff]  ;;  %vm187_vm0 = vcmask 130048   ;;  %v185_v2 = vld [vmem:[%s521_s1 + $0x10] sm:$0xff]  ;;  %s528_s9 = smov (!%p155_p4, %s445_s9), 1  ;;  %v455_v6 = vmov 1.0   ;;  %v184_v7 = vld [vmem:[%s521_s1 + $0x8] sm:$0xff] }
   0xd   : > { %396 = vmatprep.mubr.msk.f32.mxu0 %vm187_vm0, %v183_v1  ;;  %399 = vmatprep.mubr.msk.f32.mxu1 %vm187_vm0, %v185_v2  ;;  %s160_s19 = scalar_lea.vmem %s520_s0, %s528_s9  ;;  %v186_v8 = vld [vmem:[%s521_s1 + $0x18] sm:$0xff]  ;;  %s385_s24 = sshll.u32 %s528_s9, 5  ;;  %vm285_vm3 = vcmask 64512  }
   0xe   : > { %v170_v3 = vshrl.u32 %v169_v0, 7  ;;  %v374_v5 = vld [vmem:[%s160_s19] ss:$0 sm:$0xff]  ;;  %s168_s27 = scalar_lea.vmem %s522_s2, %s385_s24 }
  0x10   : > { %v171_v4 = vadd.s32 8, %v170_v3  ;;  %vm177_vm2 = vcmp.eq.s32.totalorder %v170_v3, %v374_v5 }
  0x12   : > { %vm178_vm1 = vcmp.eq.s32.totalorder %v171_v4, %v374_v5 }
  0x13   : > { %392 = vmatprep.subr.msk.mxu0 %vm178_vm1, %v455_v6  ;;  %402 = vmatprep.subr.msk.mxu1 %vm178_vm1, %v455_v6 }
  0x14   : > { %393 = vmatpush3.msk.msra.mxu0 %vm178_vm1, %v455_v6  ;;  %404 = vmatpush3.msk.msra.mxu1 %vm178_vm1, %v455_v6 }
  0x15   : > { %394 = vmatprep.subr.msk.mxu0 %vm177_vm2, %v455_v6  ;;  %403 = vmatprep.subr.msk.mxu1 %vm177_vm2, %v455_v6 }
  0x16   : > { %395 = vmatpush3.msk.msra.mxu0 %vm177_vm2, %v455_v6  ;;  %405 = vmatpush3.msk.msra.mxu1 %vm177_vm2, %v455_v6 }
  0x17   : > { %397 = vmatmul.mubr.msk.f32.vlgmr.msra.gmra.mxu0 %vm187_vm0, %v184_v7  ;;  %400 = vmatmul.mubr.msk.f32.vlgmr.msra.gmra.mxu1 %vm187_vm0, %v186_v8 }
  0xd7   : > { %v398_v9 = vpop.f32.mrf.mxu0  ;;  %v401_v10 = vpop.f32.mrf.mxu1 }
  0xd8   : > { %287 = vst.msk [vmem:[%s168_s27 + $0x8] sm:$0xff] %vm285_vm3, %v398_v9  ;;  %289 = vst.msk [vmem:[%s168_s27 + $0x18] sm:$0xff] %vm285_vm3, %v401_v10 }
  0xd9   : > { %v266_v11 = vpop.f32.mrf.mxu0  ;;  %v276_v12 = vpop.f32.mrf.mxu1 }
  0xda   : > { %286 = vst.msk [vmem:[%s168_s27] sm:$0xff] %vm285_vm3, %v266_v11  ;;  %288 = vst.msk [vmem:[%s168_s27 + $0x10] sm:$0xff] %vm285_vm3, %v276_v12 }
  0xdb PF: > { %s12_s11 = sadd.s32 1, %s453_s11   ;;  %s523_s9 = smov %s449_s10 }
  0xdc   : > { %p9_p5 = scmp.ge.s32.totalorder %s12_s11, 4   ;;  %s524_s10 = smov %s526_s12 }
  0xde   :  { %11 = sbr.rel (!%p9_p5) target bundleno = 2 (0x2), region = 58 }

</bundles_post_ra>
